<compile_context>
chip_gen: v7x
topology: tpu7x:2x2x1
jax: 0.10.0
libtpu: 0.0.40
codegen_flags: <defaults>
</compile_context>

<pallas_src>
import jax
import jax.numpy as jnp
from jax.experimental import pallas as pl
from jax.experimental.pallas import tpu as pltpu


LEAKY_SLOPE = 0.01  # nn.LeakyReLU() default negative_slope


def _leaky_relu(x):
    return jnp.where(x > 0, x, LEAKY_SLOPE * x)


def net_kernel(xT_ref, w12T_ref, b12_ref, w3T_ref, b3_ref, w4_ref, b4_ref,
               outT_ref):
    """One batch tile; layout is transposed: features on sublanes, batch on lanes."""
    # Fused input nets: block-diagonal [2H, S+A] weight applied to the
    # concatenated (state|action) input tile.  Equivalent to the two separate
    # Linears followed by torch.cat(dim=1).
    h1 = jnp.dot(w12T_ref[...], xT_ref[...],
                 preferred_element_type=jnp.float32) + b12_ref[...]
    h1 = _leaky_relu(h1)                                        # (2H, TM)

    # output net layer 1: Linear(2H -> H2) + LeakyReLU
    h3 = jnp.dot(w3T_ref[...], h1,
                 preferred_element_type=jnp.float32) + b3_ref[...]
    h3 = _leaky_relu(h3)                                        # (H2, TM)

    # final Linear(H2 -> 1) as a VPU multiply + cross-sublane reduce (keeps the
    # underfilled N=1 matmul off the MXU chain); b4 is an SMEM scalar.
    y = jnp.sum(h3 * w4_ref[...], axis=0, keepdims=True) + b4_ref[0, 0]  # (1, TM)
    outT_ref[...] = jnp.tanh(y)


def net_forward(x_state, x_action, params, *, block_b=256):
    """Fused Net forward.  Returns a list of results (one output net)."""
    (w1, b1), (w2, b2), (w3, b3), (w4, b4) = params   # weights stored [in, out]
    batch = x_state.shape[0]
    s_dim, h = w1.shape
    a_dim = w2.shape[0]
    h2 = w3.shape[1]
    out_dim = w4.shape[1]
    assert out_dim == 1, "final-layer VPU-reduction path assumes out_features == 1"
    in_total = s_dim + a_dim
    two_h = 2 * h
    f32 = jnp.float32

    # --- parameter packing (cheap XLA-side prep, once per call) ----------------
    # Block-diagonal fused input weight, transposed to [2H, S+A].
    w12T = jnp.zeros((two_h, in_total), f32)
    w12T = w12T.at[:h, :s_dim].set(w1.T.astype(f32))
    w12T = w12T.at[h:, s_dim:].set(w2.T.astype(f32))
    b12 = jnp.concatenate([b1, b2], axis=1).astype(f32).T        # (2H, 1)
    w3T = w3.T.astype(f32)                                       # (H2, 2H)
    b3c = b3.astype(f32).T                                       # (H2, 1)
    w4c = w4.astype(f32)                                         # (H2, 1)
    b4s = b4.reshape(1, 1).astype(f32)                           # (1, 1) -> SMEM

    # --- transposed, lane-dense input: features on sublanes, batch on lanes ----
    x_cat = jnp.concatenate([x_state, x_action], axis=1).astype(f32)  # (B, S+A)
    n_blocks = pl.cdiv(batch, block_b)
    b_pad = n_blocks * block_b
    xT = jnp.zeros((in_total, b_pad), f32).at[:, :batch].set(x_cat.T)

    const = lambda i: (0, 0)
    vmem = pltpu.MemorySpace.VMEM

    outT = pl.pallas_call(
        net_kernel,
        out_shape=jax.ShapeDtypeStruct((1, b_pad), f32),
        grid=(n_blocks,),
        in_specs=[
            # batch-tiled activations
            pl.BlockSpec((in_total, block_b), lambda i: (0, i), memory_space=vmem),
            # weights / biases: constant index_map -> DMA'd once, VMEM-resident
            pl.BlockSpec((two_h, in_total), const, memory_space=vmem),
            pl.BlockSpec((two_h, 1), const, memory_space=vmem),
            pl.BlockSpec((h2, two_h), const, memory_space=vmem),
            pl.BlockSpec((h2, 1), const, memory_space=vmem),
            pl.BlockSpec((h2, 1), const, memory_space=vmem),
            # final-layer scalar bias rides the scalar path
            pl.BlockSpec(memory_space=pltpu.MemorySpace.SMEM),
        ],
        out_specs=pl.BlockSpec((1, block_b), lambda i: (0, i), memory_space=vmem),
        compiler_params=pltpu.CompilerParams(
            dimension_semantics=("parallel",)),
    )(xT, w12T, b12, w3T, b3c, w4c, b4s)

    # back to the module's [B, 1] layout; Net.forward returns a list
    return [outT[0, :batch].reshape(batch, out_dim)]


def net_reference(x_state, x_action, params):
    """Pure-JAX reference of the PyTorch forward (for correctness checking)."""
    (w1, b1), (w2, b2), (w3, b3), (w4, b4) = params
    h1 = _leaky_relu(x_state @ w1 + b1)
    h2 = _leaky_relu(x_action @ w2 + b2)
    cat = jnp.concatenate([h1, h2], axis=1)
    h3 = _leaky_relu(cat @ w3 + b3)
    return [jnp.tanh(h3 @ w4 + b4)]


def _init_linear(key, in_features, out_features, weight_init):
    """Deterministic init mirroring LinearWrapper semantics.

    The PyTorch weight has shape [out, in]; the reference `fanin_init(size)`
    uses fanin = size[0] = out_features (as written in the spec).  We store the
    transposed [in, out] weight for the kernel; init choice does not affect the
    forward math being tested.
    """
    kw, kb = jax.random.split(key)
    if weight_init == 'fanin':
        v = 1.0 / jnp.sqrt(jnp.float32(out_features))   # size[0] of [out, in]
        w = jax.random.uniform(kw, (in_features, out_features),
                               jnp.float32, minval=-v, maxval=v)
    elif weight_init == 'uniform':
        init_w = 0.003
        w = jax.random.uniform(kw, (in_features, out_features),
                               jnp.float32, minval=-init_w, maxval=init_w)
    else:
        # xavier / kaiming variants fall back to a simple scaled uniform here
        v = 1.0 / jnp.sqrt(jnp.float32(in_features))
        w = jax.random.uniform(kw, (in_features, out_features),
                               jnp.float32, minval=-v, maxval=v)
    # nn.Linear default bias init: uniform(-1/sqrt(in), 1/sqrt(in)); keep as (1, out)
    bv = 1.0 / jnp.sqrt(jnp.float32(in_features))
    b = jax.random.uniform(kb, (1, out_features), jnp.float32, minval=-bv, maxval=bv)
    return w, b


if __name__ == "__main__":
    key = jax.random.PRNGKey(0)
    k_x1, k_x2, k1, k2, k3, k4 = jax.random.split(key, 6)

    batch = 2
    state_dim = 16
    action_dim = 4
    hidden = 32
    hidden2 = 32
    out_dim = 1

    # deterministic example inputs
    x_state = jax.random.normal(k_x1, (batch, state_dim), jnp.float32)
    x_action = jax.random.normal(k_x2, (batch, action_dim), jnp.float32)

    # parameters (input nets use 'fanin', final layer uses 'uniform' like DDPG)
    params = (
        _init_linear(k1, state_dim, hidden, 'fanin'),        # input net 0
        _init_linear(k2, action_dim, hidden, 'fanin'),        # input net 1
        _init_linear(k3, 2 * hidden, hidden2, 'fanin'),       # output net layer 1
        _init_linear(k4, hidden2, out_dim, 'uniform'),        # output net layer 2
    )

    results = net_forward(x_state, x_action, params)
    jax.block_until_ready(results)
    assert results[0].shape == (batch, out_dim)

    ref = net_reference(x_state, x_action, params)
    max_err = float(jnp.max(jnp.abs(results[0] - ref[0])))
    assert jnp.allclose(results[0], ref[0], atol=1e-5, rtol=1e-5), max_err

    print("KERNEL_OK")
</pallas_src>

<mosaic_0001>
module attributes {stable_mosaic.version = 11 : i64} {
  func.func @net_kernel(%arg0: i32, %arg1: memref<20x256xf32, #tpu.memory_space<vmem>>, %arg2: memref<64x20xf32, #tpu.memory_space<vmem>>, %arg3: memref<64x1xf32, #tpu.memory_space<vmem>>, %arg4: memref<32x64xf32, #tpu.memory_space<vmem>>, %arg5: memref<32x1xf32, #tpu.memory_space<vmem>>, %arg6: memref<32x1xf32, #tpu.memory_space<vmem>>, %arg7: memref<1x1xf32, #tpu.memory_space<smem>>, %arg8: memref<1x256xf32, #tpu.memory_space<vmem>>) attributes {dimension_semantics = [#tpu.dimension_semantics<parallel>], iteration_bounds = array<i64: 1>, scalar_prefetch = 0 : i64, scratch_operands = 0 : i64, tpu.core_type = #tpu.core_type<tc>, window_params = [{transform_indices = @transform_0, window_bounds = array<i64: 20, 256>}, {pipeline_mode = #tpu.pipeline_mode<synchronous>, transform_indices = @transform_1, window_bounds = array<i64: 64, 20>}, {pipeline_mode = #tpu.pipeline_mode<synchronous>, transform_indices = @transform_2, window_bounds = array<i64: 64, 1>}, {pipeline_mode = #tpu.pipeline_mode<synchronous>, transform_indices = @transform_3, window_bounds = array<i64: 32, 64>}, {pipeline_mode = #tpu.pipeline_mode<synchronous>, transform_indices = @transform_4, window_bounds = array<i64: 32, 1>}, {pipeline_mode = #tpu.pipeline_mode<synchronous>, transform_indices = @transform_5, window_bounds = array<i64: 32, 1>}, {transform_indices = @transform_6, window_bounds = array<i64: 1, 1>}, {transform_indices = @transform_7, window_bounds = array<i64: 1, 256>}]} {
    %c0 = arith.constant 0 : index
    %c0_0 = arith.constant 0 : index
    %0 = vector.load %arg2[%c0, %c0_0] : memref<64x20xf32, #tpu.memory_space<vmem>>, vector<64x20xf32>
    %c0_1 = arith.constant 0 : index
    %c0_2 = arith.constant 0 : index
    %1 = vector.load %arg1[%c0_1, %c0_2] : memref<20x256xf32, #tpu.memory_space<vmem>>, vector<20x256xf32>
    %cst = arith.constant dense<0.000000e+00> : vector<64x256xf32>
    %2 = tpu.matmul %0, %1, %cst {dimension_numbers = #tpu.dot_dimension_numbers<[1], [0], [0], [1], [0, 0, 1, 1], [], []>} : vector<64x20xf32>, vector<20x256xf32>, vector<64x256xf32> -> vector<64x256xf32>
    %c0_3 = arith.constant 0 : index
    %c0_4 = arith.constant 0 : index
    %3 = vector.load %arg3[%c0_3, %c0_4] : memref<64x1xf32, #tpu.memory_space<vmem>>, vector<64x1xf32>
    %4 = vector.broadcast %3 : vector<64x1xf32> to vector<64x256xf32>
    %5 = arith.addf %2, %4 : vector<64x256xf32>
    %cst_5 = arith.constant 0.000000e+00 : f32
    %6 = vector.broadcast %cst_5 : f32 to vector<64x256xf32>
    %7 = arith.cmpf ogt, %5, %6 : vector<64x256xf32>
    %cst_6 = arith.constant 0.00999999977 : f32
    %8 = vector.broadcast %cst_6 : f32 to vector<64x256xf32>
    %9 = arith.mulf %8, %5 : vector<64x256xf32>
    %10 = arith.select %7, %5, %9 : vector<64x256xi1>, vector<64x256xf32>
    %c0_7 = arith.constant 0 : index
    %c0_8 = arith.constant 0 : index
    %11 = vector.load %arg4[%c0_7, %c0_8] : memref<32x64xf32, #tpu.memory_space<vmem>>, vector<32x64xf32>
    %cst_9 = arith.constant dense<0.000000e+00> : vector<32x256xf32>
    %12 = tpu.matmul %11, %10, %cst_9 {dimension_numbers = #tpu.dot_dimension_numbers<[1], [0], [0], [1], [0, 0, 1, 1], [], []>} : vector<32x64xf32>, vector<64x256xf32>, vector<32x256xf32> -> vector<32x256xf32>
    %c0_10 = arith.constant 0 : index
    %c0_11 = arith.constant 0 : index
    %13 = vector.load %arg5[%c0_10, %c0_11] : memref<32x1xf32, #tpu.memory_space<vmem>>, vector<32x1xf32>
    %14 = vector.broadcast %13 : vector<32x1xf32> to vector<32x256xf32>
    %15 = arith.addf %12, %14 : vector<32x256xf32>
    %cst_12 = arith.constant 0.000000e+00 : f32
    %16 = vector.broadcast %cst_12 : f32 to vector<32x256xf32>
    %17 = arith.cmpf ogt, %15, %16 : vector<32x256xf32>
    %cst_13 = arith.constant 0.00999999977 : f32
    %18 = vector.broadcast %cst_13 : f32 to vector<32x256xf32>
    %19 = arith.mulf %18, %15 : vector<32x256xf32>
    %20 = arith.select %17, %15, %19 : vector<32x256xi1>, vector<32x256xf32>
    %c0_14 = arith.constant 0 : index
    %c0_15 = arith.constant 0 : index
    %21 = vector.load %arg6[%c0_14, %c0_15] : memref<32x1xf32, #tpu.memory_space<vmem>>, vector<32x1xf32>
    %22 = vector.broadcast %21 : vector<32x1xf32> to vector<32x256xf32>
    %23 = arith.mulf %20, %22 : vector<32x256xf32>
    %cst_16 = arith.constant dense<0.000000e+00> : vector<256xf32>
    %24 = vector.multi_reduction <add>, %23, %cst_16 [0] : vector<32x256xf32> to vector<256xf32>
    %25 = vector.shape_cast %24 : vector<256xf32> to vector<1x256xf32>
    %c0_17 = arith.constant 0 : index
    %c0_18 = arith.constant 0 : index
    %26 = memref.load %arg7[%c0_17, %c0_18] : memref<1x1xf32, #tpu.memory_space<smem>>
    %27 = vector.broadcast %26 : f32 to vector<1x256xf32>
    %28 = arith.addf %25, %27 : vector<1x256xf32>
    %29 = math.tanh %28 : vector<1x256xf32>
    %c0_19 = arith.constant 0 : index
    %c0_20 = arith.constant 0 : index
    %30 = vector.load %arg8[%c0_19, %c0_20] : memref<1x256xf32, #tpu.memory_space<vmem>>, vector<1x256xf32>
    tpu.vector_store %arg8[%c0_19, %c0_20], %29 {strides = array<i32>} : memref<1x256xf32, #tpu.memory_space<vmem>>, vector<1x256xf32>,
    return
  }
  func.func @transform_0(%arg0: i32) -> (i32, i32) {
    %c0_i32 = arith.constant 0 : i32
    %c0_i32_0 = arith.constant 0 : i32
    return %c0_i32, %arg0 : i32, i32
  }
  func.func @transform_1(%arg0: i32) -> (i32, i32) {
    %c0_i32 = arith.constant 0 : i32
    %c0_i32_0 = arith.constant 0 : i32
    %c0_i32_1 = arith.constant 0 : i32
    return %c0_i32, %c0_i32_0 : i32, i32
  }
  func.func @transform_2(%arg0: i32) -> (i32, i32) {
    %c0_i32 = arith.constant 0 : i32
    %c0_i32_0 = arith.constant 0 : i32
    %c0_i32_1 = arith.constant 0 : i32
    return %c0_i32, %c0_i32_0 : i32, i32
  }
  func.func @transform_3(%arg0: i32) -> (i32, i32) {
    %c0_i32 = arith.constant 0 : i32
    %c0_i32_0 = arith.constant 0 : i32
    %c0_i32_1 = arith.constant 0 : i32
    return %c0_i32, %c0_i32_0 : i32, i32
  }
  func.func @transform_4(%arg0: i32) -> (i32, i32) {
    %c0_i32 = arith.constant 0 : i32
    %c0_i32_0 = arith.constant 0 : i32
    %c0_i32_1 = arith.constant 0 : i32
    return %c0_i32, %c0_i32_0 : i32, i32
  }
  func.func @transform_5(%arg0: i32) -> (i32, i32) {
    %c0_i32 = arith.constant 0 : i32
    %c0_i32_0 = arith.constant 0 : i32
    %c0_i32_1 = arith.constant 0 : i32
    return %c0_i32, %c0_i32_0 : i32, i32
  }
  func.func @transform_6(%arg0: i32) -> (i32, i32) {
    %c0_i32 = arith.constant 0 : i32
    %c0_i32_0 = arith.constant 0 : i32
    %c0_i32_1 = arith.constant 0 : i32
    return %c0_i32, %c0_i32_0 : i32, i32
  }
  func.func @transform_7(%arg0: i32) -> (i32, i32) {
    %c0_i32 = arith.constant 0 : i32
    %c0_i32_0 = arith.constant 0 : i32
    return %c0_i32, %arg0 : i32, i32
  }
}

</mosaic_0001>

<bundles_post_ra>
// kernel: tpu_custom_call.1
= control target key start
LH: loop header
LB: loop body
LE: loop exit
PB: predicated region body
PF: predicated region fallthrough
CT: control target
= control target key end

     0   :  { %v598_v5 = vmov 0.0   ;;  %vm115_vm0 = vcmask 1043456   ;;  %v599_v8 = vmov 0   ;;  %vm90_vm1 = vcmask 162816   ;;  %s781_s0 = inlined_call_operand.vmem [shape: f32[20,256], index: 0, kind: input, shape index: {}]   ;;  %s782_s1 = inlined_call_operand.vmem [shape: f32[64,20], index: 1, kind: input, shape index: {}]   ;;  %s783_s2 = inlined_call_operand.vmem [shape: f32[64,1], index: 2, kind: input, shape index: {}]   ;;  %s784_s3 = inlined_call_operand.vmem [shape: f32[32,64], index: 3, kind: input, shape index: {}]   ;;  %s785_s4 = inlined_call_operand.vmem [shape: f32[32,1], index: 4, kind: input, shape index: {}]   ;;  %s786_s5 = inlined_call_operand.vmem [shape: f32[32,1], index: 5, kind: input, shape index: {}]   ;;  %s787_s6 = inlined_call_operand.<no memory space> [shape: f32[1,1], index: 6, kind: input, shape index: {}]   ;;  %s788_s7 = inlined_call_operand.hbm [shape: f32[1,256], index: 7, kind: output, shape index: {}]  }
   0x1   :  { %v37_v0 = vld [vmem:[%s781_s0 + $0x8] sm:$0xff]  ;;  %v39_v1 = vld [vmem:[%s781_s0 + $0x18] sm:$0xff]  ;;  %v36_v2 = vld [vmem:[%s781_s0] sm:$0xff]  ;;  %186 = vmatprep.mubr.f32.mxu0 %v598_v5  ;;  %388 = vmatprep.mubr.f32.mxu1 %v598_v5 }
   0x2   :  { %v544_v3 = vpack.c.bf16 %v39_v1, %v37_v0  ;;  %v38_v4 = vld [vmem:[%s781_s0 + $0x10] sm:$0xff]  ;;  %v41_v7 = vld [vmem:[%s781_s0 + $0x28] sm:$0xf]  ;;  %568 = vset.pattern.permute.xlu0 %v599_v8  ;;  %569 = vset.pattern.permute.xlu1 %v599_v8  ;;  %v42_v9 = vld [vmem:[%s783_s2] sm:$0xff] }
   0x3   :  { %v546_v6 = vpack.c.bf16 %v38_v4, %v36_v2  ;;  %v40_v10 = vld [vmem:[%s781_s0 + $0x20] sm:$0xf]  ;;  %52 = vperm.xlu0 %568, %v42_v9   ;;  %v44_v11 = vld [vmem:[%s783_s2 + $0x10] sm:$0xff]  ;;  %v43_v13 = vld [vmem:[%s783_s2 + $0x8] sm:$0xff] }
   0x4   :  { %545 = vmatprep.subr.bf16.mxu0 %v544_v3  ;;  %v28_v12 = vld [vmem:[%s782_s1] sm:$0xff]  ;;  %62 = vperm.xlu1 %569, %v44_v11   ;;  %v45_v14 = vld [vmem:[%s783_s2 + $0x18] sm:$0xff]  ;;  %v29_v15 = vld [vmem:[%s782_s1 + $0x8] sm:$0xff] }
   0x5   :  { %547 = vmatpush1.bf16.msra.mxu0 %v546_v6  ;;  %v46_v16 = vld [vmem:[%s783_s2 + $0x20] sm:$0xff] }
   0x6   :  { %530 = vmatprep.subr.msk.mxu0 %vm115_vm0, %v41_v7 }
   0x7   :  { %57 = vperm.xlu0 %568, %v43_v13  }
   0x8   :  { %67 = vperm.xlu1 %569, %v45_v14  }
   0x9   :  { %531 = vmatpush1.msk.msra.mxu0 %vm115_vm0, %v40_v10 }
   0xa   :  { %532 = vmatmul.mubr.msk.f32.vlgmr.msra.gmra.mrb[0].mxu0 %vm90_vm1, %v28_v12 }
   0xb   :  { %192 = vmatprep.mubr.f32.mxu0 %v598_v5 }
   0xc   :  { %13 = vsyncpa [#allocation4], 0  ;;  %v47_v17 = vld [vmem:[%s783_s2 + $0x28] sm:$0xff]  ;;  %72 = vperm.xlu0 %568, %v46_v16   ;;  %v30_v18 = vld [vmem:[%s782_s1 + $0x10] sm:$0xff]  ;;  %s601_s17 = smov [#allocation3]  }
   0xd   :  { %77 = vperm.xlu1 %569, %v47_v17   ;;  %v48_v19 = vld [vmem:[%s783_s2 + $0x30] sm:$0xff]  ;;  %v49_v20 = vld [vmem:[%s783_s2 + $0x38] sm:$0xff]  ;;  %v287_v22 = vld [vmem:[%s785_s4] sm:$0xff]  ;;  %s522_s18 = sshll.u32 %s601_s17, 4  ;;  %s523_s18 = int_to_ptr.vmem [resolvable:$true] %s522_s18 }
   0xe   :  { %533 = vmatmul.mubr.msk.f32.gmra.mrb[2].mxu0 %vm90_vm1, %v29_v15  ;;  %v31_v21 = vld [vmem:[%s782_s1 + $0x18] sm:$0xff]  ;;  %v288_v23 = vld [vmem:[%s785_s4 + $0x8] sm:$0xff]  ;;  %v32_v24 = vld [vmem:[%s782_s1 + $0x20] sm:$0xff]  ;;  %p579_p1 = scmp.lt.s32.totalorder %s523_s18, %s523_s18 }
   0xf   :  { %198 = vmatprep.mubr.f32.mxu0 %v598_v5  ;;  %v289_v25 = vld [vmem:[%s785_s4 + $0x10] sm:$0xff]  ;;  %v290_v26 = vld [vmem:[%s785_s4 + $0x18] sm:$0xff]  ;;  %v33_v27 = vld [vmem:[%s782_s1 + $0x28] sm:$0xff] }
  0x10   :  { %82 = vperm.xlu0 %568, %v48_v19   ;;  %v437_v28 = vld [vmem:[%s786_s5] sm:$0xff]  ;;  %v438_v29 = vld [vmem:[%s786_s5 + $0x8] sm:$0xff]  ;;  %v34_v30 = vld [vmem:[%s782_s1 + $0x30] sm:$0xff] }
  0x11   :  { %87 = vperm.xlu1 %569, %v49_v20   ;;  %v439_v31 = vld [vmem:[%s786_s5 + $0x10] sm:$0xff]  ;;  %v440_v32 = vld [vmem:[%s786_s5 + $0x18] sm:$0xff] }
  0x12   :  { %534 = vmatmul.mubr.msk.f32.gmra.mrb[4].mxu0 %vm90_vm1, %v30_v18  ;;  %v35_v33 = vld [vmem:[%s782_s1 + $0x38] sm:$0xff] }
  0x13   :  { %204 = vmatprep.mubr.f32.mxu0 %v598_v5 }
  0x14   :  { %293 = vperm.xlu0 %568, %v287_v22  }
  0x15   :  { %298 = vperm.xlu1 %569, %v288_v23  }
  0x16   :  { %535 = vmatmul.mubr.msk.f32.gmra.mrb[6].mxu0 %vm90_vm1, %v31_v21 }
  0x17   :  { %210 = vmatprep.mubr.f32.mxu0 %v598_v5 }
  0x18   :  { %303 = vperm.xlu0 %568, %v289_v25  }
  0x19   :  { %308 = vperm.xlu1 %569, %v290_v26  }
  0x1a   :  { %536 = vmatmul.mubr.msk.f32.gmra.mrb[8].mxu0 %vm90_vm1, %v32_v24 }
  0x1b   :  { %216 = vmatprep.mubr.f32.mxu0 %v598_v5 }
  0x1c   :  { %443 = vperm.xlu0 %568, %v437_v28  }
  0x1d   :  { %448 = vperm.xlu1 %569, %v438_v29  }
  0x1e   :  { %537 = vmatmul.mubr.msk.f32.gmra.mrb[10].mxu0 %vm90_vm1, %v33_v27 }
  0x1f   :  { %222 = vmatprep.mubr.f32.mxu0 %v598_v5 }
  0x20   :  { %453 = vperm.xlu0 %568, %v439_v31  }
  0x21   :  { %458 = vperm.xlu1 %569, %v440_v32  }
  0x22   :  { %538 = vmatmul.mubr.msk.f32.gmra.mrb[12].mxu0 %vm90_vm1, %v34_v30 }
  0x23   :  { %228 = vmatprep.mubr.f32.mxu0 %v598_v5 }
  0x26   :  { %539 = vmatmul.mubr.msk.f32.gmra.mrb[14].mxu0 %vm90_vm1, %v35_v33 }
  0x82   :  { %v53_v34 = vpop.permute.xlu0 %52 }
  0x83   :  { %v63_v44 = vpop.permute.xlu1 %62 }
  0x86   :  { %v58_v39 = vpop.permute.xlu0 %57 }
  0x87   :  { %v68_v59 = vpop.permute.xlu1 %67 }
  0x8b   :  { %v73_v3 = vpop.permute.xlu0 %72 }
  0x8c   :  { %v78_v16 = vpop.permute.xlu1 %77 }
  0x8f   :  { %v83_v24 = vpop.permute.xlu0 %82 }
  0xdd   :  { %v188_v35 = vpop.f32.mrb[0].mxu0 }
  0xde   :  { %v189_v36 = vadd.f32 %v188_v35, %v53_v34  ;;  %v190_v37 = vpop.f32.mrb[1].mxu0 }
  0xdf   :  { %v191_v38 = vadd.f32 %v190_v37, %v53_v34 }
  0xe0   :  { %v251_v41 = vmul.f32 0.01, %v189_v36  ;;  %vm235_vm2 = vcmp.gt.f32.partialorder %v189_v36, 0.0 }
  0xe1   :  { %v194_v40 = vpop.f32.mrb[2].mxu0  ;;  %v252_v45 = vmul.f32 0.01, %v191_v38  ;;  %vm236_vm3 = vcmp.gt.f32.partialorder %v191_v38, 0.0 }
  0xe2   :  { %v195_v42 = vadd.f32 %v194_v40, %v58_v39  ;;  %v196_v43 = vpop.f32.mrb[3].mxu0  ;;  %v267_v52 = vsel %vm235_vm2, %v189_v36, %v251_v41  ;;  %v88_v36 = vpop.permute.xlu1 %87  ;;  %vm311_vm2 = vcmask 523264  }
  0xe3   :  { %v197_v46 = vadd.f32 %v196_v43, %v58_v39  ;;  %v268_v55 = vsel %vm236_vm3, %v191_v38, %v252_v45 }
  0xe4   :  { %v253_v47 = vmul.f32 0.01, %v195_v42  ;;  %vm237_vm4 = vcmp.gt.f32.partialorder %v195_v42, 0.0 }
  0xe5   :  { %v254_v48 = vmul.f32 0.01, %v197_v46  ;;  %v200_v49 = vpop.f32.mrb[4].mxu0  ;;  %vm238_vm5 = vcmp.gt.f32.partialorder %v197_v46, 0.0 }
  0xe6   :  { %v201_v50 = vadd.f32 %v200_v49, %v63_v44  ;;  %v202_v51 = vpop.f32.mrb[5].mxu0  ;;  %v269_v53 = vsel %vm237_vm4, %v195_v42, %v253_v47 }
  0xe7   :  { %v203_v54 = vadd.f32 %v202_v51, %v63_v44  ;;  %v270_v56 = vsel %vm238_vm5, %v197_v46, %v254_v48  ;;  %v550_v57 = vpack.c.bf16 %v269_v53, %v267_v52  ;;  %v283_v51 = vld [vmem:[%s784_s3] sm:$0xff]  ;;  %v284_v52 = vld [vmem:[%s784_s3 + $0x8] sm:$0xff]  ;;  %v285_v53 = vld [vmem:[%s784_s3 + $0x10] sm:$0xff] }
  0xe8   :  { %v548_v58 = vpack.c.bf16 %v270_v56, %v268_v55  ;;  %v255_v61 = vmul.f32 0.01, %v201_v50  ;;  %vm239_vm6 = vcmp.gt.f32.partialorder %v201_v50, 0.0  ;;  %v294_v55 = vpop.permute.xlu0 %293  ;;  %v299_v56 = vpop.permute.xlu1 %298 }
  0xe9   :  { %v206_v60 = vpop.f32.mrb[6].mxu0  ;;  %v256_v0 = vmul.f32 0.01, %v203_v54  ;;  %vm240_vm7 = vcmp.gt.f32.partialorder %v203_v54, 0.0 }
  0xea   :  { %v207_v62 = vadd.f32 %v206_v60, %v68_v59  ;;  %v208_v63 = vpop.f32.mrb[7].mxu0  ;;  %549 = vmatprep.subr.bf16.mxu1 %v548_v58  ;;  %v271_v9 = vsel %vm239_vm6, %v201_v50, %v255_v61 }
  0xeb   :  { %v209_v1 = vadd.f32 %v208_v63, %v68_v59  ;;  %551 = vmatpush1.bf16.msra.mxu1 %v550_v57  ;;  %v272_v12 = vsel %vm240_vm7, %v203_v54, %v256_v0  ;;  %v286_v54 = vld [vmem:[%s784_s3 + $0x18] sm:$0xff] }
  0xec   :  { %vm241_vm8 = vcmp.gt.f32.partialorder %v207_v62, 0.0  ;;  %v257_v2 = vmul.f32 0.01, %v207_v62  ;;  %v304_v58 = vpop.permute.xlu0 %303 }
  0xed   :  { %vm242_vm9 = vcmp.gt.f32.partialorder %v209_v1, 0.0  ;;  %v258_v4 = vmul.f32 0.01, %v209_v1  ;;  %v212_v6 = vpop.f32.mrb[8].mxu0 }
  0xee   :  { %v213_v7 = vadd.f32 %v212_v6, %v73_v3  ;;  %v214_v8 = vpop.f32.mrb[9].mxu0  ;;  %v273_v10 = vsel %vm241_vm8, %v207_v62, %v257_v2  ;;  %v309_v62 = vpop.permute.xlu1 %308 }
  0xef   :  { %v215_v11 = vadd.f32 %v214_v8, %v73_v3  ;;  %v274_v13 = vsel %vm242_vm9, %v209_v1, %v258_v4  ;;  %v554_v14 = vpack.c.bf16 %v273_v10, %v271_v9 }
  0xf0   :  { %v552_v15 = vpack.c.bf16 %v274_v13, %v272_v12  ;;  %v259_v18 = vmul.f32 0.01, %v213_v7  ;;  %vm243_vm10 = vcmp.gt.f32.partialorder %v213_v7, 0.0  ;;  %v444_v4 = vpop.permute.xlu0 %443 }
  0xf1   :  { %v218_v17 = vpop.f32.mrb[10].mxu0  ;;  %v260_v21 = vmul.f32 0.01, %v215_v11  ;;  %vm244_vm11 = vcmp.gt.f32.partialorder %v215_v11, 0.0 }
  0xf2   :  { %v219_v19 = vadd.f32 %v218_v17, %v78_v16  ;;  %v220_v20 = vpop.f32.mrb[11].mxu0  ;;  %553 = vmatprep.subr.bf16.mxu1 %v552_v15  ;;  %v275_v29 = vsel %vm243_vm10, %v213_v7, %v259_v18 }
  0xf3   :  { %v221_v22 = vadd.f32 %v220_v20, %v78_v16  ;;  %555 = vmatpush1.bf16.msra.mxu1 %v554_v14  ;;  %v276_v32 = vsel %vm244_vm11, %v215_v11, %v260_v21  ;;  %v449_v11 = vpop.permute.xlu1 %448 }
  0xf4   :  { %vm245_vm12 = vcmp.gt.f32.partialorder %v219_v19, 0.0  ;;  %v261_v23 = vmul.f32 0.01, %v219_v19 }
  0xf5   :  { %vm246_vm13 = vcmp.gt.f32.partialorder %v221_v22, 0.0  ;;  %v262_v25 = vmul.f32 0.01, %v221_v22  ;;  %v224_v26 = vpop.f32.mrb[12].mxu0 }
  0xf6   :  { %v225_v27 = vadd.f32 %v224_v26, %v83_v24  ;;  %v226_v28 = vpop.f32.mrb[13].mxu0  ;;  %v277_v30 = vsel %vm245_vm12, %v219_v19, %v261_v23 }
  0xf7   :  { %v227_v31 = vadd.f32 %v226_v28, %v83_v24  ;;  %v278_v33 = vsel %vm246_vm13, %v221_v22, %v262_v25  ;;  %v558_v34 = vpack.c.bf16 %v277_v30, %v275_v29  ;;  %v454_v25 = vpop.permute.xlu0 %453 }
  0xf8   :  { %v556_v35 = vpack.c.bf16 %v278_v33, %v276_v32  ;;  %v263_v38 = vmul.f32 0.01, %v225_v27  ;;  %vm247_vm14 = vcmp.gt.f32.partialorder %v225_v27, 0.0 }
  0xf9   :  { %v230_v37 = vpop.f32.mrb[14].mxu0  ;;  %v264_v41 = vmul.f32 0.01, %v227_v31  ;;  %vm248_vm15 = vcmp.gt.f32.partialorder %v227_v31, 0.0 }
  0xfa   :  { %v231_v39 = vadd.f32 %v230_v37, %v88_v36  ;;  %v232_v40 = vpop.f32.mrb[15].mxu0  ;;  %557 = vmatprep.subr.bf16.mxu1 %v556_v35  ;;  %v279_v45 = vsel %vm247_vm14, %v225_v27, %v263_v38  ;;  %v459_v37 = vpop.permute.xlu1 %458 }
  0xfb   :  { %v233_v42 = vadd.f32 %v232_v40, %v88_v36  ;;  %559 = vmatpush1.bf16.msra.mxu1 %v558_v34  ;;  %v280_v47 = vsel %vm248_vm15, %v227_v31, %v264_v41 }
  0xfc   :  { %vm249_vm0 = vcmp.gt.f32.partialorder %v231_v39, 0.0  ;;  %v265_v43 = vmul.f32 0.01, %v231_v39 }
  0xfd   :  { %vm250_vm1 = vcmp.gt.f32.partialorder %v233_v42, 0.0  ;;  %v266_v44 = vmul.f32 0.01, %v233_v42 }
  0xfe   :  { %v281_v46 = vsel %vm249_vm0, %v231_v39, %v265_v43 }
  0xff   :  { %v282_v48 = vsel %vm250_vm1, %v233_v42, %v266_v44  ;;  %v562_v49 = vpack.c.bf16 %v281_v46, %v279_v45 }
 0x100   :  { %v560_v50 = vpack.c.bf16 %v282_v48, %v280_v47 }
 0x102   :  { %561 = vmatprep.subr.bf16.mxu1 %v560_v50 }
 0x103   :  { %563 = vmatpush1.bf16.msra.mxu1 %v562_v49 }
 0x106   :  { %540 = vmatmul.mubr.msk.f32.vlgmr.msra.gmra.mrb[0].mxu1 %vm311_vm2, %v283_v51 }
 0x107   :  { %394 = vmatprep.mubr.f32.mxu1 %v598_v5 }
 0x10a   :  { %541 = vmatmul.mubr.msk.f32.gmra.mrb[2].mxu1 %vm311_vm2, %v284_v52 }
 0x10b   :  { %400 = vmatprep.mubr.f32.mxu1 %v598_v5 }
 0x10e   :  { %542 = vmatmul.mubr.msk.f32.gmra.mrb[4].mxu1 %vm311_vm2, %v285_v53 }
 0x10f   :  { %406 = vmatprep.mubr.f32.mxu1 %v598_v5 }
 0x112   :  { %543 = vmatmul.mubr.msk.f32.gmra.mrb[6].mxu1 %vm311_vm2, %v286_v54  ;;  %v488_v54 = vstv %s787_s6  ;;  %s574_s6 = scalar_lea.vmem %s523_s18, 32 }
 0x113   :  { %p575_p0 = scmp.ne.s32.totalorder %s523_s18, %s574_s6  ;;  %p580_p2 = scmp.lt.s32.totalorder %s574_s6, %s574_s6 }
 0x115   :  { %p581_p3 = por %p580_p2, %p579_p1 }
 0x117   :  { %p582_p4 = pnand %p581_p3, %p575_p0 }
 0x1d9   :  { %v390_v57 = vpop.f32.mrb[0].mxu1 }
 0x1da   :  { %v391_v59 = vadd.f32 %v390_v57, %v294_v55  ;;  %v392_v60 = vpop.f32.mrb[1].mxu1 }
 0x1db   :  { %v393_v61 = vadd.f32 %v392_v60, %v294_v55  ;;  %v600_v60 = vmov 1966171168  }
 0x1dc   :  { %v421_v63 = vmul.f32 0.01, %v391_v59  ;;  %vm413_vm3 = vcmp.gt.f32.partialorder %v391_v59, 0.0 }
 0x1dd   :  { %v422_v0 = vmul.f32 0.01, %v393_v61  ;;  %v396_v1 = vpop.f32.mrb[2].mxu1  ;;  %vm414_vm4 = vcmp.gt.f32.partialorder %v393_v61, 0.0 }
 0x1de   :  { %v397_v2 = vadd.f32 %v396_v1, %v299_v56  ;;  %v398_v5 = vpop.f32.mrb[3].mxu1  ;;  %v429_v6 = vsel %vm413_vm3, %v391_v59, %v421_v63 }
 0x1df   :  { %v399_v3 = vadd.f32 %v398_v5, %v299_v56  ;;  %v430_v8 = vsel %vm414_vm4, %v393_v61, %v422_v0  ;;  %v461_v15 = vmul.f32 %v444_v4, %v429_v6  ;;  %v497_v61 = vunpack.c.l.s4 %v600_v60 }
 0x1e0   :  { %vm415_vm5 = vcmp.gt.f32.partialorder %v397_v2, 0.0  ;;  %v423_v7 = vmul.f32 0.01, %v397_v2  ;;  %v462_v19 = vmul.f32 %v444_v4, %v430_v8 }
 0x1e1   :  { %vm416_vm6 = vcmp.gt.f32.partialorder %v399_v3, 0.0  ;;  %v424_v9 = vmul.f32 0.01, %v399_v3  ;;  %v402_v10 = vpop.f32.mrb[4].mxu1  ;;  %v498_v63 = vunpack.c.0.s8 %v497_v61 }
 0x1e2   :  { %v431_v12 = vsel %vm415_vm5, %v397_v2, %v423_v7  ;;  %v403_v13 = vadd.f32 %v402_v10, %v304_v58  ;;  %v404_v14 = vpop.f32.mrb[5].mxu1 }
 0x1e3   :  { %v463_v16 = vmul.f32 %v449_v11, %v431_v12  ;;  %v432_v17 = vsel %vm416_vm6, %v399_v3, %v424_v9  ;;  %v405_v18 = vadd.f32 %v404_v14, %v304_v58 }
 0x1e4   :  { %v464_v20 = vmul.f32 %v449_v11, %v432_v17  ;;  %vm417_vm7 = vcmp.gt.f32.partialorder %v403_v13, 0.0  ;;  %v425_v21 = vmul.f32 0.01, %v403_v13 }
 0x1e5   :  { %v469_v22 = vadd.f32 %v463_v16, %v461_v15  ;;  %vm418_vm8 = vcmp.gt.f32.partialorder %v405_v18, 0.0  ;;  %v426_v23 = vmul.f32 0.01, %v405_v18  ;;  %v408_v24 = vpop.f32.mrb[6].mxu1 }
 0x1e6   :  { %v478_v26 = vadd.f32 %v464_v20, %v462_v19  ;;  %v433_v27 = vsel %vm417_vm7, %v403_v13, %v425_v21  ;;  %v409_v28 = vadd.f32 %v408_v24, %v309_v62  ;;  %v410_v29 = vpop.f32.mrb[7].mxu1 }
 0x1e7   :  { %v465_v30 = vmul.f32 %v454_v25, %v433_v27  ;;  %v434_v31 = vsel %vm418_vm8, %v405_v18, %v426_v23  ;;  %v411_v32 = vadd.f32 %v410_v29, %v309_v62  ;;  %v499_v62 = vlaneseq }
 0x1e8   :  { %v466_v33 = vmul.f32 %v454_v25, %v434_v31  ;;  %vm419_vm9 = vcmp.gt.f32.partialorder %v409_v28, 0.0  ;;  %v427_v34 = vmul.f32 0.01, %v409_v28 }
 0x1e9   :  { %v470_v35 = vadd.f32 %v469_v22, %v465_v30  ;;  %vm420_vm10 = vcmp.gt.f32.partialorder %v411_v32, 0.0  ;;  %v428_v36 = vmul.f32 0.01, %v411_v32  ;;  %v500_v0 = vshrl.u32 %v499_v62, 7 }
 0x1ea   :  { %v479_v38 = vadd.f32 %v478_v26, %v466_v33  ;;  %v435_v39 = vsel %vm419_vm9, %v409_v28, %v427_v34  ;;  %vm513_vm11 = vcmp.lt.s32.totalorder %v499_v62, 256 }
 0x1eb   :  { %v467_v40 = vmul.f32 %v459_v37, %v435_v39  ;;  %v436_v41 = vsel %vm420_vm10, %v411_v32, %v428_v36  ;;  %v501_v2 = vsub.s32 %v498_v63, %v500_v0 }
 0x1ec   :  { %v468_v42 = vmul.f32 %v459_v37, %v436_v41 }
 0x1ed   :  { %v471_v43 = vadd.f32 %v470_v35, %v467_v40 }
 0x1ee   :  { %v480_v44 = vadd.f32 %v479_v38, %v468_v42 }
 0x1ef   :  { %v472_v45 = vrot.slane %v471_v43, 4 }
 0x1f0   :  { %v481_v46 = vrot.slane %v480_v44, 4 }
 0x1f1   :  { %v473_v47 = vadd.f32 %v472_v45, %v471_v43 }
 0x1f2   :  { %v482_v48 = vadd.f32 %v481_v46, %v480_v44 }
 0x1f3   :  { %v474_v49 = vrot.slane %v473_v47, 2 }
 0x1f4   :  { %v483_v50 = vrot.slane %v482_v48, 2 }
 0x1f5   :  { %v475_v51 = vadd.f32 %v474_v49, %v473_v47 }
 0x1f6   :  { %v484_v52 = vadd.f32 %v483_v50, %v482_v48 }
 0x1f7   :  { %v476_v53 = vrot.slane %v475_v51, 1 }
 0x1f8   :  { %v485_v55 = vrot.slane %v484_v52, 1 }
 0x1f9   :  { %v477_v56 = vadd.f32 %v476_v53, %v475_v51 }
 0x1fa   :  { %v486_v57 = vadd.f32 %v485_v55, %v484_v52 }
 0x1fb   :  { %v489_v58 = vadd.f32 %v488_v54, %v477_v56 }
 0x1fc   :  { %v490_v59 = vadd.f32 %v488_v54, %v486_v57 }
 0x1fd   :  { %570 = vtanh.f32 %v489_v58 }
 0x1fe   :  { %572 = vtanh.f32 %v490_v59 }
 0x207   :  { %v571_v1 = vpop.eup %570 }
 0x208   :  { %v573_v5 = vpop.eup %572 }
 0x209   :  { %v495_v3 = vcombine.low %v571_v1, %v573_v5 }
 0x20b   :  { %v502_v4 = vrot.slane %v495_v3, %v501_v2 }
 0x20d   :  { %v509_v6 = vrot.slane %v502_v4, %v501_v2 }
 0x20f   :  { %515 = vst.msk [vmem:[#allocation3] sm:$0x3] %vm513_vm11, %v509_v6 }
 0x210   :  { %585 = shalt.err (!%p582_p4)
}
 0x211   :  { %s586_s21 = scalar_lea.hbm %s788_s7, 32 }
 0x212   :  { %p587_p5 = scmp.ne.s32.totalorder %s788_s7, %s586_s21  ;;  %p590_p6 = scmp.lt.u32.totalorder %s586_s21, %s788_s7 }
 0x214   :  { %p592_p7 = pnand %p590_p6, %p587_p5 }
 0x216   :  { %595 = shalt.err (!%p592_p7)
}
 0x217   :  { %525 = dma.vmem_to_hbm [thread:$0]  %s523_s18, 32, %s788_s7, [#allocation4]  }
 0x218   :  { %596 = dma.done.wait [#allocation4], 32  }
 0x219   :  { %597 = vsyncadd [#allocation4], 4294967264 }
 0x21a   :  { %529 = vsyncpa [#allocation4], 1 }

</bundles_post_ra>
